<compile_context>
chip_gen: v5e
topology: v5e:2x2
jax: 0.10.0
libtpu: 0.0.40
codegen_flags: <defaults>
</compile_context>

<pallas_src>
import functools

import jax
import jax.numpy as jnp
from jax.experimental import pallas as pl
from jax.experimental.pallas import tpu as pltpu


def _round_up(x, m):
    return (x + m - 1) // m * m


def _pick_item_tile(ip_pad, max_lanes=2048):
    """Largest multiple-of-128 divisor of ip_pad that is <= max_lanes."""
    best = 128
    t = 128
    while t <= min(ip_pad, max_lanes):
        if ip_pad % t == 0:
            best = t
        t += 128
    return best


def _vmem_limit_bytes(est_bytes):
    """Generation-aware VMEM limit: most of physical VMEM (128 MiB on v5e/v6e,
    64 MiB/TC on v7x) minus compiler-scratch headroom, floored at 32 MiB."""
    try:
        cap = int(pltpu.get_tpu_info().vmem_capacity_bytes)
    except Exception:
        cap = 64 << 20                      # conservative fallback, fits every gen
    headroom = 12 << 20
    limit = max(int(est_bytes * 1.25), 32 << 20)
    return int(max(min(limit, cap - headroom), 16 << 20))


def _pmf_train_kernel(r_ref, ut0_ref, vt0_ref,
                      ut_ref, vt_ref, loss_ref,
                      but_ref, bvt_ref, gu_ref, lacc_ref,
                      *, lambda_U, lambda_V, momentum, learning_rate,
                      iterations, tile_i, num_tiles):
    """Full SGD-with-momentum training loop with R resident in VMEM.

    Layouts (latent axis padded to kp sublanes, NOT 128 lanes):
      r_ref    : (Up, Ip)      f32  ratings; 0 == unobserved (== torch's I)
      ut_ref   : (kp, Up)      f32  U^T  (output ref doubles as live state)
      vt_ref   : (kp, Ip)      f32  V^T  (output ref doubles as live state)
      but/bvt  : momentum buffers, same layouts as ut/vt
      gu_ref   : (Up, kp)      f32  per-iteration dL/dU accumulator (natural)
      lacc_ref : (1, tile_i)   f32  deferred loss partial (reduced once at end)
    """
    f32 = jnp.float32

    # ---- state init ----
    ut_ref[...] = ut0_ref[...]
    vt_ref[...] = vt0_ref[...]
    but_ref[...] = jnp.zeros_like(but_ref)
    bvt_ref[...] = jnp.zeros_like(bvt_ref)
    lacc_ref[...] = jnp.zeros_like(lacc_ref)

    def tile_step(off, ut_k, un_k):
        """One item tile: pred / E exist only at tile granularity."""
        vt_tile = vt_ref[:, pl.ds(off, tile_i)]           # (kp, Ti)  V_k tile
        r_tile = r_ref[:, pl.ds(off, tile_i)]             # (Up, Ti)

        # Masked residual; the indicator is recomputed inline (never stored).
        pred_t = jnp.dot(un_k, vt_tile, preferred_element_type=f32)
        e_t = jnp.where(r_tile != 0.0, r_tile - pred_t, 0.0)

        # Deferred loss partials: sublane-axis sums are mostly vreg-wise VPU
        # adds; the single cross-lane reduce happens after the training loop.
        lacc_ref[...] += (jnp.sum(e_t * e_t, axis=0, keepdims=True)
                          + lambda_V * jnp.sum(vt_tile * vt_tile, axis=0,
                                               keepdims=True))

        # dL/dU partial in natural (Up, kp) layout: E_t @ V_tile.
        # Only the tiny (kp, Ti) V tile is transposed -- never the residual.
        gu_ref[...] += jnp.dot(e_t, vt_tile.T, preferred_element_type=f32)

        # dL/dV^T tile = -2 * U_k^T @ E_t + 2*lambda_V*V^T_tile  (plain matmul,
        # lands directly in the stored transposed layout).  Momentum update of
        # this V tile in place; all gradients use pre-update U_k / V_k, matching
        # the simultaneous optimizer.step() of the reference.
        gvt_t = (-2.0 * jnp.dot(ut_k, e_t, preferred_element_type=f32)
                 + (2.0 * lambda_V) * vt_tile)
        bvt_t = momentum * bvt_ref[:, pl.ds(off, tile_i)] + gvt_t
        bvt_ref[:, pl.ds(off, tile_i)] = bvt_t
        vt_ref[:, pl.ds(off, tile_i)] = vt_tile - learning_rate * bvt_t

    def iter_body(step, loss_u):
        ut_k = ut_ref[...]                  # (kp, Up)  U_k
        un_k = ut_k.T                       # (Up, kp)  small transpose, once/iter
        loss_u = loss_u + lambda_U * jnp.sum(ut_k * ut_k)

        gu_ref[...] = jnp.zeros_like(gu_ref)
        if num_tiles <= 8:                  # static unroll (LLO visibility)
            for t in range(num_tiles):
                tile_step(t * tile_i, ut_k, un_k)
        else:
            def _tl(t, carry):
                tile_step(pl.multiple_of(t * tile_i, 128), ut_k, un_k)
                return carry
            jax.lax.fori_loop(0, num_tiles, _tl, 0)

        # Finish the (simultaneous) U update:  dL/dU = -2 E V + 2*lambda_U*U.
        gut = (-2.0 * gu_ref[...] + (2.0 * lambda_U) * un_k).T   # (kp, Up)
        but_new = momentum * but_ref[...] + gut
        but_ref[...] = but_new
        ut_ref[...] = ut_k - learning_rate * but_new
        return loss_u

    loss_u = jax.lax.fori_loop(0, iterations, iter_body, f32(0.0))
    loss_ref[0, 0] = jnp.sum(lacc_ref[...]) + loss_u


def make_pmf_train(up, ip, kp, tile_i, *, lambda_U, lambda_V, momentum,
                   learning_rate, iterations):
    """Returns f(R, Ut0, Vt0) -> (Ut_final, Vt_final, loss_sum[1,1]), one pallas_call."""
    num_tiles = ip // tile_i
    kernel = functools.partial(
        _pmf_train_kernel,
        lambda_U=lambda_U, lambda_V=lambda_V, momentum=momentum,
        learning_rate=learning_rate, iterations=iterations,
        tile_i=tile_i, num_tiles=num_tiles)

    vmem = pl.BlockSpec(memory_space=pltpu.MemorySpace.VMEM)
    smem = pl.BlockSpec(memory_space=pltpu.MemorySpace.SMEM)

    # Accurate peak-residency estimate (all f32):
    #   R + (Ut0, Ut, bUt) + (Vt0, Vt, bVt) + gU (lanes pad kp->128)
    #   + loss partial + ~4 tile-sized temporaries (pred, E, E*E, cmp/where).
    est = 4 * (up * ip
               + 3 * kp * up + 3 * kp * ip
               + up * 128
               + 8 * tile_i
               + 4 * up * tile_i)
    vmem_limit = _vmem_limit_bytes(est)

    return pl.pallas_call(
        kernel,
        out_shape=(
            jax.ShapeDtypeStruct((kp, up), jnp.float32),   # U^T final
            jax.ShapeDtypeStruct((kp, ip), jnp.float32),   # V^T final
            jax.ShapeDtypeStruct((1, 1), jnp.float32),     # sum of per-step losses
        ),
        in_specs=[vmem, vmem, vmem],
        out_specs=(vmem, vmem, smem),
        scratch_shapes=[
            pltpu.VMEM((kp, up), jnp.float32),     # momentum buffer for U^T
            pltpu.VMEM((kp, ip), jnp.float32),     # momentum buffer for V^T
            pltpu.VMEM((up, kp), jnp.float32),     # per-iteration dL/dU accumulator
            pltpu.VMEM((1, tile_i), jnp.float32),  # deferred loss partial
        ],
        compiler_params=pltpu.CompilerParams(vmem_limit_bytes=vmem_limit),
    )


def pmf_forward(num_users, num_items, train_data, *,
                latent_size=5, lambda_U=0.01, lambda_V=0.01,
                momentum=0.8, learning_rate=0.001, iterations=100,
                key=None):
    """JAX/Pallas equivalent of PMF.forward (flag=0 path, aspect=[])."""
    # --- build R from train_data (glue, as in the torch module) ---
    users = jnp.array([int(e[0]) for e in train_data], dtype=jnp.int32)
    items = jnp.array([int(e[1]) for e in train_data], dtype=jnp.int32)
    vals = jnp.array([float(e[2]) for e in train_data], dtype=jnp.float32)

    # Layout-friendly padding.  Zero padding is mathematically exact: padded R
    # rows/cols are "unobserved", padded factor entries start at zero and get
    # exactly-zero gradients, so they stay zero for all iterations.
    up = _round_up(max(num_users, 128), 128)   # users: lanes of U^T / sublanes of R
    ip = _round_up(max(num_items, 128), 128)   # items: lanes of V^T and R
    kp = _round_up(max(latent_size, 8), 8)     # latent: 8 sublanes, NOT 128 lanes
    tile_i = _pick_item_tile(ip)

    R = jnp.zeros((up, ip), jnp.float32).at[users, items].set(vals)

    # --- deterministic init of U, V (stand-in for torch.randn) ---
    if key is None:
        key = jax.random.PRNGKey(0)
    k_u, k_v = jax.random.split(key)
    U0 = jax.random.normal(k_u, (num_users, latent_size), jnp.float32)
    V0 = jax.random.normal(k_v, (num_items, latent_size), jnp.float32)
    Ut0 = jnp.zeros((kp, up), jnp.float32).at[:latent_size, :num_users].set(U0.T)
    Vt0 = jnp.zeros((kp, ip), jnp.float32).at[:latent_size, :num_items].set(V0.T)

    train_fn = make_pmf_train(
        up, ip, kp, tile_i,
        lambda_U=lambda_U, lambda_V=lambda_V, momentum=momentum,
        learning_rate=learning_rate, iterations=iterations)

    Utp, Vtp, loss_sum = jax.jit(train_fn)(R, Ut0, Vt0)

    U = Utp[:latent_size, :num_users].T
    V = Vtp[:latent_size, :num_items].T
    u_list = list(U)
    v_list = list(V)
    return u_list, v_list, loss_sum[0, 0] / len(train_data)


if __name__ == "__main__":
    # Small deterministic problem: 8 users, 16 items, latent_size=5 (module default).
    num_users, num_items = 8, 16
    key = jax.random.PRNGKey(0)
    k_data, k_params = jax.random.split(key)

    # Synthetic training triplets (user, item, rating in 1..5).
    n_obs = 24
    ku, ki, kr = jax.random.split(k_data, 3)
    obs_u = jax.random.randint(ku, (n_obs,), 0, num_users)
    obs_i = jax.random.randint(ki, (n_obs,), 0, num_items)
    obs_r = jax.random.randint(kr, (n_obs,), 1, 6).astype(jnp.float32)
    train_data = [(int(u), int(i), float(r))
                  for u, i, r in zip(obs_u.tolist(), obs_i.tolist(), obs_r.tolist())]

    u_list, v_list, mean_loss = pmf_forward(
        num_users, num_items, train_data,
        latent_size=5, lambda_U=0.01, lambda_V=0.01,
        momentum=0.8, learning_rate=0.001, iterations=100,
        key=k_params)

    jax.block_until_ready(mean_loss)
    jax.block_until_ready(u_list[0])
    jax.block_until_ready(v_list[0])
    print("KERNEL_OK")
</pallas_src>

<mosaic_0001>
module attributes {stable_mosaic.version = 11 : i64} {
  func.func @_pmf_train_kernel(%arg0: memref<128x128xf32, #tpu.memory_space<vmem>>, %arg1: memref<8x128xf32, #tpu.memory_space<vmem>>, %arg2: memref<8x128xf32, #tpu.memory_space<vmem>>, %arg3: memref<8x128xf32, #tpu.memory_space<vmem>>, %arg4: memref<8x128xf32, #tpu.memory_space<vmem>>, %arg5: memref<1x1xf32, #tpu.memory_space<smem>>, %arg6: memref<8x128xf32, #tpu.memory_space<vmem>>, %arg7: memref<8x128xf32, #tpu.memory_space<vmem>>, %arg8: memref<128x8xf32, #tpu.memory_space<vmem>>, %arg9: memref<1x128xf32, #tpu.memory_space<vmem>>) attributes {dimension_semantics = [], scalar_prefetch = 0 : i64, scratch_operands = 4 : i64, tpu.core_type = #tpu.core_type<tc>} {
    %c0 = arith.constant 0 : index
    %c0_0 = arith.constant 0 : index
    %0 = vector.load %arg1[%c0, %c0_0] : memref<8x128xf32, #tpu.memory_space<vmem>>, vector<8x128xf32>
    %c0_1 = arith.constant 0 : index
    %c0_2 = arith.constant 0 : index
    %1 = vector.load %arg3[%c0_1, %c0_2] : memref<8x128xf32, #tpu.memory_space<vmem>>, vector<8x128xf32>
    tpu.vector_store %arg3[%c0_1, %c0_2], %0 {strides = array<i32>} : memref<8x128xf32, #tpu.memory_space<vmem>>, vector<8x128xf32>,
    %c0_3 = arith.constant 0 : index
    %c0_4 = arith.constant 0 : index
    %2 = vector.load %arg2[%c0_3, %c0_4] : memref<8x128xf32, #tpu.memory_space<vmem>>, vector<8x128xf32>
    %c0_5 = arith.constant 0 : index
    %c0_6 = arith.constant 0 : index
    %3 = vector.load %arg4[%c0_5, %c0_6] : memref<8x128xf32, #tpu.memory_space<vmem>>, vector<8x128xf32>
    tpu.vector_store %arg4[%c0_5, %c0_6], %2 {strides = array<i32>} : memref<8x128xf32, #tpu.memory_space<vmem>>, vector<8x128xf32>,
    %cst = arith.constant 0.000000e+00 : f32
    %4 = vector.broadcast %cst : f32 to vector<8x128xf32>
    %c0_7 = arith.constant 0 : index
    %c0_8 = arith.constant 0 : index
    %5 = vector.load %arg6[%c0_7, %c0_8] : memref<8x128xf32, #tpu.memory_space<vmem>>, vector<8x128xf32>
    tpu.vector_store %arg6[%c0_7, %c0_8], %4 {strides = array<i32>} : memref<8x128xf32, #tpu.memory_space<vmem>>, vector<8x128xf32>,
    %cst_9 = arith.constant 0.000000e+00 : f32
    %6 = vector.broadcast %cst_9 : f32 to vector<8x128xf32>
    %c0_10 = arith.constant 0 : index
    %c0_11 = arith.constant 0 : index
    %7 = vector.load %arg7[%c0_10, %c0_11] : memref<8x128xf32, #tpu.memory_space<vmem>>, vector<8x128xf32>
    tpu.vector_store %arg7[%c0_10, %c0_11], %6 {strides = array<i32>} : memref<8x128xf32, #tpu.memory_space<vmem>>, vector<8x128xf32>,
    %cst_12 = arith.constant 0.000000e+00 : f32
    %8 = vector.broadcast %cst_12 : f32 to vector<1x128xf32>
    %c0_13 = arith.constant 0 : index
    %c0_14 = arith.constant 0 : index
    %9 = vector.load %arg9[%c0_13, %c0_14] : memref<1x128xf32, #tpu.memory_space<vmem>>, vector<1x128xf32>
    tpu.vector_store %arg9[%c0_13, %c0_14], %8 {strides = array<i32>} : memref<1x128xf32, #tpu.memory_space<vmem>>, vector<1x128xf32>,
    %cst_15 = arith.constant 0.000000e+00 : f32
    %c0_i32 = arith.constant 0 : i32
    %c100_i32 = arith.constant 100 : i32
    %10 = arith.addi %c0_i32, %c100_i32 : i32
    %c1_i32 = arith.constant 1 : i32
    %11 = scf.for %arg10 = %c0_i32 to %10 step %c1_i32 iter_args(%arg11 = %cst_15) -> (f32)  : i32 {
      %c0_21 = arith.constant 0 : index
      %c0_22 = arith.constant 0 : index
      %19 = vector.load %arg3[%c0_21, %c0_22] : memref<8x128xf32, #tpu.memory_space<vmem>>, vector<8x128xf32>
      %20 = tpu.transpose %19, [1, 0] : vector<8x128xf32> -> vector<128x8xf32>
      %21 = arith.mulf %19, %19 : vector<8x128xf32>
      %22 = vector.shape_cast %21 : vector<8x128xf32> to vector<1x8x128xf32>
      %cst_23 = arith.constant dense<0.000000e+00> : vector<1xf32>
      %23 = vector.multi_reduction <add>, %22, %cst_23 [1, 2] : vector<1x8x128xf32> to vector<1xf32>
      %24 = vector.shape_cast %23 : vector<1xf32> to vector<1x1x1xf32>
      %25 = vector.extract %24[0, 0, 0] : f32 from vector<1x1x1xf32>
      %cst_24 = arith.constant 0.00999999977 : f32
      %26 = arith.mulf %cst_24, %25 : f32
      %27 = arith.addf %arg11, %26 : f32
      %cst_25 = arith.constant 0.000000e+00 : f32
      %28 = vector.broadcast %cst_25 : f32 to vector<128x8xf32>
      %c0_26 = arith.constant 0 : index
      %c0_27 = arith.constant 0 : index
      %29 = vector.load %arg8[%c0_26, %c0_27] : memref<128x8xf32, #tpu.memory_space<vmem>>, vector<128x8xf32>
      tpu.vector_store %arg8[%c0_26, %c0_27], %28 {strides = array<i32>} : memref<128x8xf32, #tpu.memory_space<vmem>>, vector<128x8xf32>,
      %c0_28 = arith.constant 0 : index
      %c0_29 = arith.constant 0 : index
      %30 = vector.load %arg4[%c0_28, %c0_29] : memref<8x128xf32, #tpu.memory_space<vmem>>, vector<8x128xf32>
      %c0_30 = arith.constant 0 : index
      %c0_31 = arith.constant 0 : index
      %31 = vector.load %arg0[%c0_30, %c0_31] : memref<128x128xf32, #tpu.memory_space<vmem>>, vector<128x128xf32>
      %cst_32 = arith.constant dense<0.000000e+00> : vector<128x128xf32>
      %32 = tpu.matmul %20, %30, %cst_32 {dimension_numbers = #tpu.dot_dimension_numbers<[1], [0], [0], [1], [0, 0, 1, 1], [], []>} : vector<128x8xf32>, vector<8x128xf32>, vector<128x128xf32> -> vector<128x128xf32>
      %cst_33 = arith.constant 0.000000e+00 : f32
      %33 = vector.broadcast %cst_33 : f32 to vector<128x128xf32>
      %34 = arith.cmpf one, %31, %33 : vector<128x128xf32>
      %35 = arith.subf %31, %32 : vector<128x128xf32>
      %cst_34 = arith.constant 0.000000e+00 : f32
      %36 = vector.broadcast %cst_34 : f32 to vector<128x128xf32>
      %37 = arith.select %34, %35, %36 : vector<128x128xi1>, vector<128x128xf32>
      %c0_35 = arith.constant 0 : index
      %c0_36 = arith.constant 0 : index
      %38 = vector.load %arg9[%c0_35, %c0_36] : memref<1x128xf32, #tpu.memory_space<vmem>>, vector<1x128xf32>
      %39 = arith.mulf %37, %37 : vector<128x128xf32>
      %cst_37 = arith.constant dense<0.000000e+00> : vector<128xf32>
      %40 = vector.multi_reduction <add>, %39, %cst_37 [0] : vector<128x128xf32> to vector<128xf32>
      %41 = vector.shape_cast %40 : vector<128xf32> to vector<1x128xf32>
      %42 = arith.mulf %30, %30 : vector<8x128xf32>
      %cst_38 = arith.constant dense<0.000000e+00> : vector<128xf32>
      %43 = vector.multi_reduction <add>, %42, %cst_38 [0] : vector<8x128xf32> to vector<128xf32>
      %44 = vector.shape_cast %43 : vector<128xf32> to vector<1x128xf32>
      %cst_39 = arith.constant 0.00999999977 : f32
      %45 = vector.broadcast %cst_39 : f32 to vector<1x128xf32>
      %46 = arith.mulf %45, %44 : vector<1x128xf32>
      %47 = arith.addf %41, %46 : vector<1x128xf32>
      %48 = arith.addf %38, %47 : vector<1x128xf32>
      %c0_40 = arith.constant 0 : index
      %c0_41 = arith.constant 0 : index
      %49 = vector.load %arg9[%c0_40, %c0_41] : memref<1x128xf32, #tpu.memory_space<vmem>>, vector<1x128xf32>
      tpu.vector_store %arg9[%c0_40, %c0_41], %48 {strides = array<i32>} : memref<1x128xf32, #tpu.memory_space<vmem>>, vector<1x128xf32>,
      %c0_42 = arith.constant 0 : index
      %c0_43 = arith.constant 0 : index
      %50 = vector.load %arg8[%c0_42, %c0_43] : memref<128x8xf32, #tpu.memory_space<vmem>>, vector<128x8xf32>
      %51 = tpu.transpose %30, [1, 0] : vector<8x128xf32> -> vector<128x8xf32>
      %cst_44 = arith.constant dense<0.000000e+00> : vector<128x8xf32>
      %52 = tpu.matmul %37, %51, %cst_44 {dimension_numbers = #tpu.dot_dimension_numbers<[1], [0], [0], [1], [0, 0, 1, 1], [], []>} : vector<128x128xf32>, vector<128x8xf32>, vector<128x8xf32> -> vector<128x8xf32>
      %53 = arith.addf %50, %52 : vector<128x8xf32>
      %c0_45 = arith.constant 0 : index
      %c0_46 = arith.constant 0 : index
      %54 = vector.load %arg8[%c0_45, %c0_46] : memref<128x8xf32, #tpu.memory_space<vmem>>, vector<128x8xf32>
      tpu.vector_store %arg8[%c0_45, %c0_46], %53 {strides = array<i32>} : memref<128x8xf32, #tpu.memory_space<vmem>>, vector<128x8xf32>,
      %cst_47 = arith.constant dense<0.000000e+00> : vector<8x128xf32>
      %55 = tpu.matmul %19, %37, %cst_47 {dimension_numbers = #tpu.dot_dimension_numbers<[1], [0], [0], [1], [0, 0, 1, 1], [], []>} : vector<8x128xf32>, vector<128x128xf32>, vector<8x128xf32> -> vector<8x128xf32>
      %cst_48 = arith.constant -2.000000e+00 : f32
      %56 = vector.broadcast %cst_48 : f32 to vector<8x128xf32>
      %57 = arith.mulf %56, %55 : vector<8x128xf32>
      %cst_49 = arith.constant 2.000000e-02 : f32
      %58 = vector.broadcast %cst_49 : f32 to vector<8x128xf32>
      %59 = arith.mulf %58, %30 : vector<8x128xf32>
      %60 = arith.addf %57, %59 : vector<8x128xf32>
      %c0_50 = arith.constant 0 : index
      %c0_51 = arith.constant 0 : index
      %61 = vector.load %arg7[%c0_50, %c0_51] : memref<8x128xf32, #tpu.memory_space<vmem>>, vector<8x128xf32>
      %cst_52 = arith.constant 8.000000e-01 : f32
      %62 = vector.broadcast %cst_52 : f32 to vector<8x128xf32>
      %63 = arith.mulf %62, %61 : vector<8x128xf32>
      %64 = arith.addf %63, %60 : vector<8x128xf32>
      %c0_53 = arith.constant 0 : index
      %c0_54 = arith.constant 0 : index
      %65 = vector.load %arg7[%c0_53, %c0_54] : memref<8x128xf32, #tpu.memory_space<vmem>>, vector<8x128xf32>
      tpu.vector_store %arg7[%c0_53, %c0_54], %64 {strides = array<i32>} : memref<8x128xf32, #tpu.memory_space<vmem>>, vector<8x128xf32>,
      %cst_55 = arith.constant 1.000000e-03 : f32
      %66 = vector.broadcast %cst_55 : f32 to vector<8x128xf32>
      %67 = arith.mulf %66, %64 : vector<8x128xf32>
      %68 = arith.subf %30, %67 : vector<8x128xf32>
      %c0_56 = arith.constant 0 : index
      %c0_57 = arith.constant 0 : index
      %69 = vector.load %arg4[%c0_56, %c0_57] : memref<8x128xf32, #tpu.memory_space<vmem>>, vector<8x128xf32>
      tpu.vector_store %arg4[%c0_56, %c0_57], %68 {strides = array<i32>} : memref<8x128xf32, #tpu.memory_space<vmem>>, vector<8x128xf32>,
      %c0_58 = arith.constant 0 : index
      %c0_59 = arith.constant 0 : index
      %70 = vector.load %arg8[%c0_58, %c0_59] : memref<128x8xf32, #tpu.memory_space<vmem>>, vector<128x8xf32>
      %cst_60 = arith.constant -2.000000e+00 : f32
      %71 = vector.broadcast %cst_60 : f32 to vector<128x8xf32>
      %72 = arith.mulf %71, %70 : vector<128x8xf32>
      %cst_61 = arith.constant 2.000000e-02 : f32
      %73 = vector.broadcast %cst_61 : f32 to vector<128x8xf32>
      %74 = arith.mulf %73, %20 : vector<128x8xf32>
      %75 = arith.addf %72, %74 : vector<128x8xf32>
      %76 = tpu.transpose %75, [1, 0] : vector<128x8xf32> -> vector<8x128xf32>
      %c0_62 = arith.constant 0 : index
      %c0_63 = arith.constant 0 : index
      %77 = vector.load %arg6[%c0_62, %c0_63] : memref<8x128xf32, #tpu.memory_space<vmem>>, vector<8x128xf32>
      %cst_64 = arith.constant 8.000000e-01 : f32
      %78 = vector.broadcast %cst_64 : f32 to vector<8x128xf32>
      %79 = arith.mulf %78, %77 : vector<8x128xf32>
      %80 = arith.addf %79, %76 : vector<8x128xf32>
      %c0_65 = arith.constant 0 : index
      %c0_66 = arith.constant 0 : index
      %81 = vector.load %arg6[%c0_65, %c0_66] : memref<8x128xf32, #tpu.memory_space<vmem>>, vector<8x128xf32>
      tpu.vector_store %arg6[%c0_65, %c0_66], %80 {strides = array<i32>} : memref<8x128xf32, #tpu.memory_space<vmem>>, vector<8x128xf32>,
      %cst_67 = arith.constant 1.000000e-03 : f32
      %82 = vector.broadcast %cst_67 : f32 to vector<8x128xf32>
      %83 = arith.mulf %82, %80 : vector<8x128xf32>
      %84 = arith.subf %19, %83 : vector<8x128xf32>
      %c0_68 = arith.constant 0 : index
      %c0_69 = arith.constant 0 : index
      %85 = vector.load %arg3[%c0_68, %c0_69] : memref<8x128xf32, #tpu.memory_space<vmem>>, vector<8x128xf32>
      tpu.vector_store %arg3[%c0_68, %c0_69], %84 {strides = array<i32>} : memref<8x128xf32, #tpu.memory_space<vmem>>, vector<8x128xf32>,
      scf.yield %27 : f32
    }
    %c0_16 = arith.constant 0 : index
    %c0_17 = arith.constant 0 : index
    %12 = vector.load %arg9[%c0_16, %c0_17] : memref<1x128xf32, #tpu.memory_space<vmem>>, vector<1x128xf32>
    %13 = vector.shape_cast %12 : vector<1x128xf32> to vector<1x1x128xf32>
    %cst_18 = arith.constant dense<0.000000e+00> : vector<1xf32>
    %14 = vector.multi_reduction <add>, %13, %cst_18 [1, 2] : vector<1x1x128xf32> to vector<1xf32>
    %15 = vector.shape_cast %14 : vector<1xf32> to vector<1x1x1xf32>
    %16 = vector.extract %15[0, 0, 0] : f32 from vector<1x1x1xf32>
    %17 = arith.addf %16, %11 : f32
    %c0_19 = arith.constant 0 : index
    %c0_20 = arith.constant 0 : index
    %18 = memref.load %arg5[%c0_19, %c0_20] : memref<1x1xf32, #tpu.memory_space<smem>>
    memref.store %17, %arg5[%c0_19, %c0_20] : memref<1x1xf32, #tpu.memory_space<smem>>
    return
  }
}

</mosaic_0001>

<bundles_post_ra>
// kernel: tpu_custom_call.1
= control target key start
LH: loop header
LB: loop body
LE: loop exit
PB: predicated region body
PF: predicated region fallthrough
CT: control target
= control target key end

     0   :  { %11 = vsyncpa [#allocation7], 0  ;;  %s1330_s0 = inlined_call_operand.hbm [shape: f32[128,128], index: 0, kind: input, shape index: {}]   ;;  %s1331_s1 = inlined_call_operand.hbm [shape: f32[8,128], index: 1, kind: input, shape index: {}]   ;;  %s1332_s2 = inlined_call_operand.hbm [shape: f32[8,128], index: 2, kind: input, shape index: {}]   ;;  %s1333_s3 = inlined_call_operand.hbm [shape: f32[8,128], index: 3, kind: output, shape index: {0}]   ;;  %s1334_s4 = inlined_call_operand.hbm [shape: f32[8,128], index: 4, kind: output, shape index: {1}]   ;;  %s1335_s5 = inlined_call_operand.hbm [shape: f32[1,1], index: 5, kind: output, shape index: {2}]  }
   0x1   :  { %12 = vsyncpa [#allocation11], 0 }
   0x2   :  { %13 = vsyncpa [#allocation8], 0 }
   0x3   :  { %14 = vsyncpa [#allocation15], 0  ;;  %s34_s20 = sshll.u32 %s1331_s1, 4  ;;  %s35_s20 = int_to_ptr.hbm [resolvable:$true] %s34_s20 }
   0x4   :  { %15 = vsyncpa [#allocation9], 0  ;;  %s922_s21 = smov [#allocation10]   ;;  %s20_s25 = sshll.u32 %s1330_s0, 4  ;;  %s21_s25 = int_to_ptr.hbm [resolvable:$true] %s20_s25 }
   0x5   :  { %s36_s22 = sshll.u32 %s922_s21, 4  ;;  %s923_s26 = smov [#allocation6]   ;;  %s37_s22 = int_to_ptr.vmem [resolvable:$true] %s36_s22 }
   0x6   :  { %39 = dma.hbm_to_vmem [thread:$0]  %s35_s20, 128, %s37_s22, [#allocation11]  }
   0x7   :  { %s22_s27 = sshll.u32 %s923_s26, 4  ;;  %s924_s28 = smov 128   ;;  %s23_s27 = int_to_ptr.vmem [resolvable:$true] %s22_s27 }
   0x8   :  { %s925_s29 = smov 8   ;;  %s45_s1 = sshll.u32 %s1332_s2, 4  ;;  %s46_s1 = int_to_ptr.hbm [resolvable:$true] %s45_s1 }
   0x9   :  { %28 = dma.hbm_to_vmem [thread:$0]  %s21_s25, 2048, %s23_s27, [#allocation7], %s924_s28, %s924_s28, %s925_s29  }
   0xa   :  { %s926_s7 = smov [#allocation12]  }
   0xb   :  { %s47_s8 = sshll.u32 %s926_s7, 4  ;;  %s48_s8 = int_to_ptr.vmem [resolvable:$true] %s47_s8 }
   0xc   :  { %50 = dma.hbm_to_vmem [thread:$0]  %s46_s1, 128, %s48_s8, [#allocation11]  }
   0xd   :  { %904 = dma.done.wait [#allocation7], 2048  }
   0xe   :  { %905 = vsyncadd [#allocation7], 4294965248 }
   0xf   :  { %906 = dma.done.wait [#allocation11], 256  }
  0x10   :  { %907 = vsyncadd [#allocation11], 4294967040  ;;  %v927_v0 = vmov 0.0   ;;  %v63_v1 = vld [vmem:[#allocation10] sm:$0xff]  ;;  %v65_v2 = vld [vmem:[#allocation12] sm:$0xff]  ;;  %s971_s0 = smov 0.0  }
  0x11   :  { %67 = vst [vmem:[#allocation2] sm:$0xff] %v927_v0  ;;  %s973_s2 = smov 0  }
  0x12   :  { %68 = vst [vmem:[#allocation3] sm:$0xff] %v927_v0 }
  0x13   :  { %69 = vst [vmem:[#allocation5] sm:$0x1] %v927_v0 }
  0x14   :  { %64 = vst [vmem:[#allocation13] sm:$0xff] %v63_v1 }
  0x15   :  { %66 = vst [vmem:[#allocation14] sm:$0xff] %v65_v2 }
  0x16 LB: > { %vm122_vm0 = vcmask 64512   ;;  %v1054_v21 = vld [vmem:[#allocation6] sm:$0xff]  ;;  %v1063_v24 = vld [vmem:[#allocation6 + $0x8] sm:$0xff]  ;;  %v1072_v27 = vld [vmem:[#allocation6 + $0x10] sm:$0xff]  ;;  %v928_v54 = vmov 0.0   ;;  %s75_s2 = sadd.s32 1, %s920_s2   ;;  %s920_s2 = sphi %s973_s2, %s75_s2   ;;  %s916_s0 = sphi %s971_s0, %s1364_s0  }
  0x17   : > { %vm1343_vm1 = vcmp.ne.f32.partialorder %v1054_v21, 0.0  ;;  %vm270_vm2 = vcmp.ne.f32.partialorder %v1063_v24, 0.0  ;;  %vm271_vm3 = vcmp.ne.f32.partialorder %v1072_v27, 0.0  ;;  %v1081_v30 = vld [vmem:[#allocation6 + $0x18] sm:$0xff]  ;;  %v1090_v33 = vld [vmem:[#allocation6 + $0x20] sm:$0xff]  ;;  %v1099_v36 = vld [vmem:[#allocation6 + $0x28] sm:$0xff] }
  0x18   : > { %vm272_vm4 = vcmp.ne.f32.partialorder %v1081_v30, 0.0  ;;  %vm273_vm5 = vcmp.ne.f32.partialorder %v1090_v33, 0.0  ;;  %vm274_vm6 = vcmp.ne.f32.partialorder %v1099_v36, 0.0  ;;  %v1108_v39 = vld [vmem:[#allocation6 + $0x30] sm:$0xff]  ;;  %v1117_v42 = vld [vmem:[#allocation6 + $0x38] sm:$0xff]  ;;  %v1126_v45 = vld [vmem:[#allocation6 + $0x40] sm:$0xff] }
  0x19   : > { %vm275_vm7 = vcmp.ne.f32.partialorder %v1108_v39, 0.0  ;;  %vm276_vm8 = vcmp.ne.f32.partialorder %v1117_v42, 0.0  ;;  %vm277_vm9 = vcmp.ne.f32.partialorder %v1126_v45, 0.0  ;;  %v1135_v48 = vld [vmem:[#allocation6 + $0x48] sm:$0xff]  ;;  %v1144_v51 = vld [vmem:[#allocation6 + $0x50] sm:$0xff]  ;;  %123 = vst.msk [vmem:[#allocation4] sm:$0xff] %vm122_vm0, %v928_v54 }
  0x1a   : > { %vm278_vm10 = vcmp.ne.f32.partialorder %v1135_v48, 0.0  ;;  %vm279_vm11 = vcmp.ne.f32.partialorder %v1144_v51, 0.0  ;;  %124 = vst.msk [vmem:[#allocation4 + $0x8] sm:$0xff] %vm122_vm0, %v928_v54  ;;  %v1155_v55 = vld [vmem:[#allocation6 + $0x58] sm:$0xff]  ;;  %v1181_v61 = vld [vmem:[#allocation6 + $0x60] sm:$0xff]  ;;  %p72_p0 = scmp.ge.s32.totalorder %s75_s2, 100  }
  0x1b   : > { %v981_v3 = vld [vmem:[#allocation13] sm:$0xff]  ;;  %125 = vst.msk [vmem:[#allocation4 + $0x10] sm:$0xff] %vm122_vm0, %v928_v54  ;;  %vm280_vm12 = vcmp.ne.f32.partialorder %v1155_v55, 0.0  ;;  %vm281_vm13 = vcmp.ne.f32.partialorder %v1181_v61, 0.0  ;;  %s929_s12 = smov (%p72_p0), [#allocation13]   ;;  %s634_s16 = sshll.u32 (%p72_p0), %s1333_s3, 4  ;;  %s635_s16 = int_to_ptr.hbm [resolvable:$true] %s634_s16 }
  0x1c   : > { %v983_v4 = vld [vmem:[#allocation14] sm:$0xff]  ;;  %78 = vxpose.xlu0.b32.start.end [1/1] (short) %v981_v3, 128  ;;  %126 = vst.msk [vmem:[#allocation4 + $0x18] sm:$0xff] %vm122_vm0, %v928_v54  ;;  %s632_s13 = sshll.u32 (%p72_p0), %s929_s12, 4  ;;  %s930_s17 = smov (%p72_p0), [#allocation14]   ;;  %s633_s13 = int_to_ptr.vmem [resolvable:$true] %s632_s13 }
  0x1d   : > { %1346 = vst [vmem:[#allocation22_spill] sm:$0xff] %v983_v4  ;;  %219 = vmatpush.msra.mxu0 %v983_v4  ;;  %732 = vmatpush.msra.mxu2 %v983_v4  ;;  %s643_s18 = sshll.u32 (%p72_p0), %s930_s17, 4  ;;  %s645_s21 = sshll.u32 (%p72_p0), %s1334_s4, 4  ;;  %s644_s18 = int_to_ptr.vmem [resolvable:$true] %s643_s18  ;;  %s646_s21 = int_to_ptr.hbm [resolvable:$true] %s645_s21 }
  0x1e   : > { %397 = vmatpush.xpose.msra.mxu1 %v983_v4  ;;  %733 = vmatpush.xpose.msra.mxu3 %v983_v4  ;;  %127 = vst.msk [vmem:[#allocation4 + $0x20] sm:$0xff] %vm122_vm0, %v928_v54  ;;  %s654_s23 = sshll.u32 (%p72_p0), %s1335_s5, 4  ;;  %s931_s4 = smov (%p72_p0), [#allocation16]   ;;  %s655_s23 = int_to_ptr.hbm [resolvable:$true] %s654_s23 }
  0x1f   : > { %128 = vst.msk [vmem:[#allocation4 + $0x28] sm:$0xff] %vm122_vm0, %v928_v54 }
  0x20   : > { %129 = vst.msk [vmem:[#allocation4 + $0x30] sm:$0xff] %vm122_vm0, %v928_v54 }
  0x21   : > { %130 = vst.msk [vmem:[#allocation4 + $0x38] sm:$0xff] %vm122_vm0, %v928_v54 }
  0x22   : > { %131 = vst.msk [vmem:[#allocation4 + $0x40] sm:$0xff] %vm122_vm0, %v928_v54 }
  0x23   : > { %132 = vst.msk [vmem:[#allocation4 + $0x48] sm:$0xff] %vm122_vm0, %v928_v54 }
  0x24   : > { %133 = vst.msk [vmem:[#allocation4 + $0x50] sm:$0xff] %vm122_vm0, %v928_v54 }
  0x25   : > { %134 = vst.msk [vmem:[#allocation4 + $0x58] sm:$0xff] %vm122_vm0, %v928_v54 }
  0x26   : > { %135 = vst.msk [vmem:[#allocation4 + $0x60] sm:$0xff] %vm122_vm0, %v928_v54 }
  0x27   : > { %136 = vst.msk [vmem:[#allocation4 + $0x68] sm:$0xff] %vm122_vm0, %v928_v54 }
  0x28   : > { %137 = vst.msk [vmem:[#allocation4 + $0x70] sm:$0xff] %vm122_vm0, %v928_v54 }
  0x29   : > { %138 = vst.msk [vmem:[#allocation4 + $0x78] sm:$0xff] %vm122_vm0, %v928_v54 }
  0xc0   : > { %v990_v5 = vpop.trf.xlu0 }
  0xc1   : > { %684 = vmatmul.msk.f32.vlgmr.msra.gmra.mxu0 %vm122_vm0, %v990_v5 }
  0xc8   : > { %v994_v6 = vpop.trf.xlu0 }
  0xc9   : > { %685 = vmatmul.msk.f32.gmra.mxu0 %vm122_vm0, %v994_v6 }
  0xd0   : > { %v998_v7 = vpop.trf.xlu0 }
  0xd1   : > { %686 = vmatmul.msk.f32.gmra.mxu0 %vm122_vm0, %v998_v7 }
  0xd8   : > { %v1002_v8 = vpop.trf.xlu0 }
  0xd9   : > { %687 = vmatmul.msk.f32.gmra.mxu0 %vm122_vm0, %v1002_v8 }
  0xe0   : > { %v1006_v9 = vpop.trf.xlu0 }
  0xe1   : > { %688 = vmatmul.msk.f32.gmra.mxu0 %vm122_vm0, %v1006_v9 }
  0xe8   : > { %v1010_v10 = vpop.trf.xlu0 }
  0xe9   : > { %689 = vmatmul.msk.f32.gmra.mxu0 %vm122_vm0, %v1010_v10 }
  0xf0   : > { %v1014_v11 = vpop.trf.xlu0 }
  0xf1   : > { %690 = vmatmul.msk.f32.gmra.mxu0 %vm122_vm0, %v1014_v11 }
  0xf8   : > { %v1018_v12 = vpop.trf.xlu0 }
  0xf9   : > { %691 = vmatmul.msk.f32.gmra.mxu0 %vm122_vm0, %v1018_v12 }
 0x100   : > { %v1022_v13 = vpop.trf.xlu0 }
 0x101   : > { %692 = vmatmul.msk.f32.gmra.mxu0 %vm122_vm0, %v1022_v13 }
 0x108   : > { %v1026_v14 = vpop.trf.xlu0 }
 0x109   : > { %1347 = vst [vmem:[#allocation23_spill] sm:$0xff] %v1026_v14  ;;  %693 = vmatmul.msk.f32.vlgmr.msra.gmra.mxu2 %vm122_vm0, %v1026_v14 }
 0x110   : > { %v1030_v15 = vpop.trf.xlu0 }
 0x111   : > { %1348 = vst [vmem:[#allocation24_spill] sm:$0xff] %v1030_v15  ;;  %694 = vmatmul.msk.f32.gmra.mxu2 %vm122_vm0, %v1030_v15 }
 0x118   : > { %v1034_v16 = vpop.trf.xlu0 }
 0x119   : > { %1349 = vst [vmem:[#allocation25_spill] sm:$0xff] %v1034_v16  ;;  %695 = vmatmul.msk.f32.gmra.mxu2 %vm122_vm0, %v1034_v16  ;;  %v366_v16 = vld [vmem:[#allocation4] sm:$0xff] }
 0x120   : > { %v1038_v17 = vpop.trf.xlu0 }
 0x121   : > { %1350 = vst [vmem:[#allocation26_spill] sm:$0xff] %v1038_v17  ;;  %696 = vmatmul.msk.f32.gmra.mxu2 %vm122_vm0, %v1038_v17 }
 0x128   : > { %v1042_v18 = vpop.trf.xlu0 }
 0x129   : > { %1351 = vst [vmem:[#allocation27_spill] sm:$0xff] %v1042_v18  ;;  %697 = vmatmul.msk.f32.gmra.mxu2 %vm122_vm0, %v1042_v18 }
 0x130   : > { %v1046_v19 = vpop.trf.xlu0 }
 0x131   : > { %1352 = vst [vmem:[#allocation28_spill] sm:$0xff] %v1046_v19  ;;  %698 = vmatmul.msk.f32.gmra.mxu2 %vm122_vm0, %v1046_v19 }
 0x138   : > { %v1050_v20 = vpop.trf.xlu0 }
 0x139   : > { %1353 = vst [vmem:[#allocation29_spill] sm:$0xff] %v1050_v20  ;;  %699 = vmatmul.msk.f32.gmra.mxu2 %vm122_vm0, %v1050_v20 }
 0x13e   : > { %v221_v22 = vpop.f32.mrf.mxu0 }
 0x13f   : > { %v1058_v23 = vsub.f32 %v1054_v21, %v221_v22 }
 0x141   : > { %700 = vmatmul.msk.f32.vlgmr.msra.gmra.mxu1 %vm1343_vm1, %v1058_v23  ;;  %v301_v59 = vsel %vm1343_vm1, %v1058_v23, 0.0 }
 0x142   : > { %v318_v0 = vmul.f32 %v301_v59, %v301_v59 }
 0x146   : > { %v224_v25 = vpop.f32.mrf.mxu0 }
 0x147   : > { %v1067_v26 = vsub.f32 %v1063_v24, %v224_v25  ;;  %v371_v24 = vld [vmem:[#allocation4 + $0x28] sm:$0xff] }
 0x149   : > { %701 = vmatmul.msk.f32.gmra.mxu1 %vm270_vm2, %v1067_v26  ;;  %v302_v58 = vsel %vm270_vm2, %v1067_v26, 0.0 }
 0x14a   : > { %v319_v62 = vmul.f32 %v302_v58, %v302_v58 }
 0x14e   : > { %v227_v28 = vpop.f32.mrf.mxu0 }
 0x14f   : > { %v1076_v29 = vsub.f32 %v1072_v27, %v227_v28  ;;  %v334_v28 = vadd.f32 %v319_v62, %v318_v0  ;;  %v544_v27 = vmul.f32 0.02, %v1002_v8 }
 0x151   : > { %702 = vmatmul.msk.f32.gmra.mxu1 %vm271_vm3, %v1076_v29  ;;  %v303_v60 = vsel %vm271_vm3, %v1076_v29, 0.0 }
 0x152   : > { %v320_v1 = vmul.f32 %v303_v60, %v303_v60 }
 0x156   : > { %v230_v31 = vpop.f32.mrf.mxu0 }
 0x157   : > { %v1085_v32 = vsub.f32 %v1081_v30, %v230_v31 }
 0x159   : > { %703 = vmatmul.msk.f32.gmra.mxu1 %vm272_vm4, %v1085_v32  ;;  %v304_v63 = vsel %vm272_vm4, %v1085_v32, 0.0 }
 0x15a   : > { %v321_v31 = vmul.f32 %v304_v63, %v304_v63 }
 0x15e   : > { %v233_v34 = vpop.f32.mrf.mxu0 }
 0x15f   : > { %v1094_v35 = vsub.f32 %v1090_v33, %v233_v34 }
 0x161   : > { %704 = vmatmul.msk.f32.gmra.mxu1 %vm273_vm5, %v1094_v35  ;;  %v305_v22 = vsel %vm273_vm5, %v1094_v35, 0.0 }
 0x166   : > { %v236_v37 = vpop.f32.mrf.mxu0 }
 0x167   : > { %v1103_v38 = vsub.f32 %v1099_v36, %v236_v37  ;;  %v335_v37 = vadd.f32 %v334_v28, %v320_v1 }
 0x169   : > { %705 = vmatmul.msk.f32.gmra.mxu1 %vm274_vm6, %v1103_v38  ;;  %v306_v34 = vsel %vm274_vm6, %v1103_v38, 0.0 }
 0x16a   : > { %v323_v54 = vmul.f32 %v306_v34, %v306_v34 }
 0x16e   : > { %v239_v40 = vpop.f32.mrf.mxu0 }
 0x16f   : > { %v1112_v41 = vsub.f32 %v1108_v39, %v239_v40  ;;  %v322_v40 = vmul.f32 %v305_v22, %v305_v22 }
 0x171   : > { %706 = vmatmul.msk.f32.gmra.mxu1 %vm275_vm7, %v1112_v41 }
 0x176   : > { %v242_v43 = vpop.f32.mrf.mxu0 }
 0x177   : > { %v1121_v44 = vsub.f32 %v1117_v42, %v242_v43  ;;  %v110_v43 = vmul.f32 %v981_v3, %v981_v3  ;;  %v369_v42 = vld [vmem:[#allocation4 + $0x18] sm:$0xff] }
 0x179   : > { %707 = vmatmul.msk.f32.gmra.mxu1 %vm276_vm8, %v1121_v44  ;;  %111 = vadd.xlane.f32.xlu0 %v110_v43 }
 0x17e   : > { %v245_v46 = vpop.f32.mrf.mxu0 }
 0x17f   : > { %v1130_v47 = vsub.f32 %v1126_v45, %v245_v46  ;;  %v307_v46 = vsel %vm275_vm7, %v1112_v41, 0.0 }
 0x180   : > { %v324_v59 = vmul.f32 %v307_v46, %v307_v46 }
 0x181   : > { %708 = vmatmul.msk.f32.gmra.mxu1 %vm277_vm9, %v1130_v47  ;;  %v309_v62 = vsel %vm277_vm9, %v1130_v47, 0.0 }
 0x182   : > { %v326_v28 = vmul.f32 %v309_v62, %v309_v62 }
 0x18c   : > { %v248_v49 = vpop.f32.mrf.mxu2 }
 0x18d   : > { %v1139_v50 = vsub.f32 %v1135_v48, %v248_v49  ;;  %v153_v49 = vld [vmem:[#allocation6 + $0x68] sm:$0xff] }
 0x18e   : > { %vm282_vm14 = vcmp.ne.f32.partialorder %v153_v49, 0.0 }
 0x18f   : > { %709 = vmatmul.msk.f32.vlgmr.msra.gmra.mxu3 %vm278_vm10, %v1139_v50 }
 0x194   : > { %v251_v52 = vpop.f32.mrf.mxu2 }
 0x195   : > { %v1148_v53 = vsub.f32 %v1144_v51, %v251_v52  ;;  %v336_v52 = vadd.f32 %v335_v37, %v321_v31  ;;  %v355_v31 = vmul.f32 %v983_v4, %v983_v4  ;;  %v154_v37 = vld [vmem:[#allocation6 + $0x70] sm:$0xff] }
 0x196   : > { %vm283_vm15 = vcmp.ne.f32.partialorder %v154_v37, 0.0 }
 0x197   : > { %710 = vmatmul.msk.f32.gmra.mxu3 %vm279_vm11, %v1148_v53  ;;  %v337_v58 = vadd.f32 %v336_v52, %v322_v40  ;;  %v311_v34 = vsel %vm279_vm11, %v1148_v53, 0.0 }
 0x199   : > { %v338_v0 = vadd.f32 %v337_v58, %v323_v54  ;;  %v328_v54 = vmul.f32 %v311_v34, %v311_v34  ;;  %v356_v58 = vrot.slane %v355_v31, 4  ;;  %v155_v34 = vld [vmem:[#allocation6 + $0x78] sm:$0xff] }
 0x19a   : > { %vm284_vm1 = vcmp.ne.f32.partialorder %v155_v34, 0.0 }
 0x19b   : > { %v339_v22 = vadd.f32 %v338_v0, %v324_v59 }
 0x19c   : > { %v254_v56 = vpop.f32.mrf.mxu2 }
 0x19d   : > { %v1163_v57 = vsub.f32 %v1155_v55, %v254_v56  ;;  %v308_v56 = vsel %vm276_vm8, %v1121_v44, 0.0 }
 0x19e   : > { %v325_v1 = vmul.f32 %v308_v56, %v308_v56 }
 0x19f   : > { %711 = vmatmul.msk.f32.gmra.mxu3 %vm280_vm12, %v1163_v57  ;;  %v312_v46 = vsel %vm280_vm12, %v1163_v57, 0.0 }
 0x1a0   : > { %v340_v40 = vadd.f32 %v339_v22, %v325_v1  ;;  %v329_v0 = vmul.f32 %v312_v46, %v312_v46  ;;  %v357_v22 = vadd.f32 %v356_v58, %v355_v31 }
 0x1a2   : > { %v341_v52 = vadd.f32 %v340_v40, %v326_v28 }
 0x1a4   : > { %v257_v2 = vpop.f32.mrf.mxu2 }
 0x1a5   : > { %v1195_v25 = vsub.f32 %v1181_v61, %v257_v2  ;;  %v310_v2 = vsel %vm278_vm10, %v1139_v50, 0.0 }
 0x1a6   : > { %v327_v43 = vmul.f32 %v310_v2, %v310_v2 }
 0x1a7   : > { %712 = vmatmul.msk.f32.gmra.mxu3 %vm281_vm13, %v1195_v25  ;;  %v313_v59 = vsel %vm281_vm13, %v1195_v25, 0.0 }
 0x1a8   : > { %v342_v62 = vadd.f32 %v341_v52, %v327_v43  ;;  %v330_v2 = vmul.f32 %v313_v59, %v313_v59 }
 0x1aa   : > { %v343_v1 = vadd.f32 %v342_v62, %v328_v54 }
 0x1ac   : > { %v260_v60 = vpop.f32.mrf.mxu2  ;;  %v344_v40 = vadd.f32 %v343_v1, %v329_v0  ;;  %v367_v0 = vld [vmem:[#allocation4 + $0x8] sm:$0xff] }
 0x1ad   : > { %v298_v63 = vsub.f32 %v153_v49, %v260_v60 }
 0x1ae   : > { %v345_v19 = vadd.f32 %v344_v40, %v330_v2 }
 0x1af   : > { %713 = vmatmul.msk.f32.gmra.mxu3 %vm282_vm14, %v298_v63  ;;  %v314_v4 = vsel %vm282_vm14, %v298_v63, 0.0 }
 0x1b0   : > { %v331_v20 = vmul.f32 %v314_v4, %v314_v4 }
 0x1b2   : > { %v346_v46 = vadd.f32 %v345_v19, %v331_v20  ;;  %v541_v20 = vmul.f32 0.02, %v990_v5 }
 0x1b4   : > { %v263_v56 = vpop.f32.mrf.mxu2 }
 0x1b5   : > { %v299_v60 = vsub.f32 %v154_v37, %v263_v56  ;;  %v358_v56 = vrot.slane %v357_v22, 2 }
 0x1b7   : > { %714 = vmatmul.msk.f32.gmra.mxu3 %vm283_vm15, %v299_v60  ;;  %v315_v28 = vsel %vm283_vm15, %v299_v60, 0.0  ;;  %v359_v58 = vadd.f32 %v358_v56, %v357_v22 }
 0x1b8   : > { %v332_v18 = vmul.f32 %v315_v28, %v315_v28  ;;  %v545_v28 = vmul.f32 0.02, %v1006_v9 }
 0x1b9   : > { %v360_v62 = vrot.slane %v359_v58, 1 }
 0x1ba   : > { %v347_v54 = vadd.f32 %v346_v46, %v332_v18 }
 0x1bc   : > { %v266_v17 = vpop.f32.mrf.mxu2 }
 0x1bd   : > { %v300_v43 = vsub.f32 %v155_v34, %v266_v17  ;;  %v372_v34 = vld [vmem:[#allocation4 + $0x30] sm:$0xff] }
 0x1be   : > { %v399_v52 = vpop.f32.mrf.mxu1 }
 0x1bf   : > { %v447_v15 = vadd.f32 %v399_v52, %v366_v16  ;;  %v316_v14 = vsel %vm284_vm1, %v300_v43, 0.0  ;;  %715 = vmatmul.msk.f32.gmra.mxu3 %vm284_vm1, %v300_v43  ;;  %716 = vmatpush.msk.msrb.mxu2 %vm284_vm1, %v300_v43  ;;  %vm1354_vm1 = vcmp.ne.f32.partialorder %v1054_v21, 0.0  ;;  %v546_v43 = vmul.f32 0.02, %v1010_v10 }
 0x1c0   : > { %v333_v31 = vmul.f32 %v316_v14, %v316_v14 }
 0x1c1   : > { %463 = vst.msk [vmem:[#allocation4] sm:$0xff] %vm122_vm0, %v447_v15  ;;  %717 = vmatpush.msk.msrb.mxu2 %vm283_vm15, %v299_v60  ;;  %v361_v15 = vadd.f32 %v360_v62, %v359_v58  ;;  %v317_v60 = vld [vmem:[#allocation5] sm:$0x1] }
 0x1c2   : > { %v348_v4 = vadd.f32 %v347_v54, %v333_v31  ;;  %v373_v54 = vld [vmem:[#allocation4 + $0x38] sm:$0xff] }
 0x1c3   : > { %718 = vmatpush.msk.msrb.mxu2 %vm282_vm14, %v298_v63  ;;  %v368_v63 = vld [vmem:[#allocation4 + $0x10] sm:$0xff] }
 0x1c4   : > { %v349_v59 = vrot.slane %v348_v4, 4 }
 0x1c5   : > { %719 = vmatpush.msk.msrb.mxu2 %vm281_vm13, %v1195_v25 }
 0x1c6   : > { %v350_v16 = vadd.f32 %v349_v59, %v348_v4  ;;  %v402_v17 = vpop.f32.mrf.mxu1  ;;  %v547_v4 = vmul.f32 0.02, %v1014_v11 }
 0x1c7   : > { %v448_v19 = vadd.f32 %v402_v17, %v367_v0  ;;  %720 = vmatpush.msk.msrb.mxu2 %vm280_vm12, %v1163_v57  ;;  %v362_v57 = vmul.f32 0.01, %v361_v15  ;;  %v374_v0 = vld [vmem:[#allocation4 + $0x40] sm:$0xff] }
 0x1c8   : > { %v351_v14 = vrot.slane %v350_v16, 2  ;;  %v509_v18 = vld [vmem:[#allocation4] sm:$0xff] }
 0x1c9   : > { %464 = vst.msk [vmem:[#allocation4 + $0x8] sm:$0xff] %vm122_vm0, %v448_v19  ;;  %721 = vmatpush.msk.msrb.mxu2 %vm279_vm11, %v1148_v53  ;;  %v525_v61 = vmul.f32 -2.0, %v509_v18  ;;  %v548_v19 = vmul.f32 0.02, %v1018_v12 }
 0x1ca   : > { %v352_v25 = vadd.f32 %v351_v14, %v350_v16 }
 0x1cb   : > { %722 = vmatpush.msk.msrb.mxu2 %vm278_vm10, %v1139_v50  ;;  %v557_v49 = vadd.f32 %v541_v20, %v525_v61  ;;  %v542_v50 = vmul.f32 0.02, %v994_v6  ;;  %v549_v20 = vmul.f32 0.02, %v1022_v13 }
 0x1cc   : > { %v353_v55 = vrot.slane %v352_v25, 1 }
 0x1cd   : > { %573 = vxpose.xlu1.b32.start [1/16] (narrow) %v557_v49, 8  ;;  %723 = vmatpush.msk.msrb.mxu2 %vm277_vm9, %v1130_v47 }
 0x1ce   : > { %v354_v5 = vadd.f32 %v353_v55, %v352_v25  ;;  %v405_v37 = vpop.f32.mrf.mxu1  ;;  %v375_v25 = vld [vmem:[#allocation4 + $0x48] sm:$0xff] }
 0x1cf   : > { %v449_v51 = vadd.f32 %v405_v37, %v368_v63  ;;  %724 = vmatpush.msk.msrb.mxu2 %vm276_vm8, %v1121_v44  ;;  %v1355_v37 = vld [vmem:[#allocation23_spill] sm:$0xff] }
 0x1d0   : > { %v363_v53 = vadd.f32 %v362_v57, %v354_v5  ;;  %v510_v48 = vld [vmem:[#allocation4 + $0x8] sm:$0xff]  ;;  %v376_v57 = vld [vmem:[#allocation4 + $0x50] sm:$0xff] }
 0x1d1   : > { %465 = vst.msk [vmem:[#allocation4 + $0x10] sm:$0xff] %vm122_vm0, %v449_v51  ;;  %725 = vmatpush.msk.msrb.mxu2 %vm275_vm7, %v1112_v41  ;;  %v526_v45 = vmul.f32 -2.0, %v510_v48  ;;  %v543_v41 = vmul.f32 0.02, %v998_v7 }
 0x1d2   : > { %v364_v47 = vadd.f32 %v363_v53, %v317_v60  ;;  %v550_v60 = vmul.f32 0.02, %v1355_v37 }
 0x1d3   : > { %726 = vmatpush.msk.msrb.mxu2 %vm274_vm6, %v1103_v38  ;;  %v558_v1 = vadd.f32 %v542_v50, %v526_v45  ;;  %v377_v50 = vld [vmem:[#allocation4 + $0x58] sm:$0xff] }
 0x1d4   : > { %365 = vst [vmem:[#allocation5] sm:$0x1] %v364_v47 }
 0x1d5   : > { %574 = vxpose.xlu1.b32.cont [2/16] (narrow) %v558_v1, 8  ;;  %727 = vmatpush.msk.msrb.mxu2 %vm273_vm5, %v1094_v35  ;;  %v370_v35 = vld [vmem:[#allocation4 + $0x20] sm:$0xff] }
 0x1d6   : > { %v408_v6 = vpop.f32.mrf.mxu1 }
 0x1d7   : > { %v450_v44 = vadd.f32 %v408_v6, %v369_v42  ;;  %728 = vmatpush.msk.msrb.mxu2 %vm272_vm4, %v1085_v32 }
 0x1d8   : > { %v511_v39 = vld [vmem:[#allocation4 + $0x10] sm:$0xff] }
 0x1d9   : > { %466 = vst.msk [vmem:[#allocation4 + $0x18] sm:$0xff] %vm122_vm0, %v450_v44  ;;  %729 = vmatpush.msk.msrb.mxu2 %vm271_vm3, %v1076_v29  ;;  %v527_v36 = vmul.f32 -2.0, %v511_v39  ;;  %v1356_v39 = vld [vmem:[#allocation24_spill] sm:$0xff] }
 0x1db   : > { %730 = vmatpush.msk.msrb.mxu2 %vm270_vm2, %v1067_v26  ;;  %v559_v33 = vadd.f32 %v543_v41, %v527_v36  ;;  %v551_v41 = vmul.f32 0.02, %v1356_v39 }
 0x1dd   : > { %575 = vxpose.xlu1.b32.cont [3/16] (narrow) %v559_v33, 8  ;;  %731 = vmatpush.msk.msrb.mxu2 %vm1354_vm1, %v1058_v23 }
 0x1de   : > { %v411_v30 = vpop.f32.mrf.mxu1  ;;  %495 = vmatmul.f32.vlgmr.msrb.gmra.mxu2 %v981_v3 }
 0x1df   : > { %v451_v7 = vadd.f32 %v411_v30, %v370_v35  ;;  %v378_v30 = vld [vmem:[#allocation4 + $0x60] sm:$0xff] }
 0x1e0   : > { %v512_v32 = vld [vmem:[#allocation4 + $0x18] sm:$0xff] }
 0x1e1   : > { %467 = vst.msk [vmem:[#allocation4 + $0x20] sm:$0xff] %vm122_vm0, %v451_v7  ;;  %v528_v29 = vmul.f32 -2.0, %v512_v32 }
 0x1e3   : > { %v560_v38 = vadd.f32 %v544_v27, %v528_v29 }
 0x1e5   : > { %576 = vxpose.xlu1.b32.cont [4/16] (narrow) %v560_v38, 8  ;;  %v1357_v38 = vld [vmem:[#allocation25_spill] sm:$0xff] }
 0x1e6   : > { %v414_v26 = vpop.f32.mrf.mxu1 }
 0x1e7   : > { %v452_v2 = vadd.f32 %v414_v26, %v371_v24  ;;  %v552_v24 = vmul.f32 0.02, %v1357_v38 }
 0x1e8   : > { %v513_v22 = vld [vmem:[#allocation4 + $0x20] sm:$0xff] }
 0x1e9   : > { %468 = vst.msk [vmem:[#allocation4 + $0x28] sm:$0xff] %vm122_vm0, %v452_v2  ;;  %v529_v21 = vmul.f32 -2.0, %v513_v22  ;;  %v379_v22 = vld [vmem:[#allocation4 + $0x68] sm:$0xff] }
 0x1eb   : > { %v561_v23 = vadd.f32 %v545_v28, %v529_v21 }
 0x1ec   : > { %v112_v53 = vpop.xlane.xlu0 %111 }
 0x1ed   : > { %577 = vxpose.xlu1.b32.cont [5/16] (narrow) %v561_v23, 8  ;;  %v113_v48 = vrot.slane %v112_v53, 4 }
 0x1ee   : > { %v417_v40 = vpop.f32.mrf.mxu1 }
 0x1ef   : > { %v453_v56 = vadd.f32 %v417_v40, %v372_v34  ;;  %v114_v45 = vadd.f32 %v113_v48, %v112_v53  ;;  %v1358_v34 = vld [vmem:[#allocation26_spill] sm:$0xff]  ;;  %v605_v53 = vld [vmem:[#allocation2] sm:$0xff] }
 0x1f0   : > { %v514_v8 = vld [vmem:[#allocation4 + $0x28] sm:$0xff]  ;;  %v553_v40 = vmul.f32 0.02, %v1358_v34  ;;  %v606_v48 = vmul.f32 0.8, %v605_v53 }
 0x1f1   : > { %469 = vst.msk [vmem:[#allocation4 + $0x30] sm:$0xff] %vm122_vm0, %v453_v56  ;;  %v530_v46 = vmul.f32 -2.0, %v514_v8  ;;  %v115_v1 = vrot.slane %v114_v45, 2 }
 0x1f3   : > { %v562_v52 = vadd.f32 %v546_v43, %v530_v46  ;;  %v116_v44 = vadd.f32 %v115_v1, %v114_v45  ;;  %v380_v43 = vld [vmem:[#allocation4 + $0x70] sm:$0xff]  ;;  %v612_v1 = vld [vmem:[#allocation5] sm:$0x1] (%p72_p0) }
 0x1f5   : > { %578 = vxpose.xlu1.b32.cont [6/16] (narrow) %v562_v52, 8  ;;  %v117_v33 = vrot.slane %v116_v44, 1 }
 0x1f6   : > { %v420_v31 = vpop.f32.mrf.mxu1 }
 0x1f7   : > { %v454_v58 = vadd.f32 %v420_v31, %v373_v54  ;;  %v118_v7 = vadd.f32 %v117_v33, %v116_v44  ;;  %v1359_v31 = vld [vmem:[#allocation27_spill] sm:$0xff] }
 0x1f8   : > { %v515_v9 = vld [vmem:[#allocation4 + $0x30] sm:$0xff] }
 0x1f9   : > { %470 = vst.msk [vmem:[#allocation4 + $0x38] sm:$0xff] %vm122_vm0, %v454_v58  ;;  %v531_v59 = vmul.f32 -2.0, %v515_v9  ;;  %v554_v58 = vmul.f32 0.02, %v1359_v31 }
 0x1fa   : > { %734 = vpush %v118_v7 }
 0x1fb   : > { %v563_v62 = vadd.f32 %v547_v4, %v531_v59  ;;  %v381_v59 = vld [vmem:[#allocation4 + $0x78] sm:$0xff] }
 0x1fd   : > { %579 = vxpose.xlu1.b32.cont [7/16] (narrow) %v563_v62, 8 }
 0x1fe   : > { %v423_v16 = vpop.f32.mrf.mxu1 }
 0x1ff   : > { %v455_v17 = vadd.f32 %v423_v16, %v374_v0 }
 0x200   : > { %v516_v10 = vld [vmem:[#allocation4 + $0x38] sm:$0xff] }
 0x201   : > { %471 = vst.msk [vmem:[#allocation4 + $0x40] sm:$0xff] %vm122_vm0, %v455_v17  ;;  %v532_v14 = vmul.f32 -2.0, %v516_v10  ;;  %v1360_v17 = vld [vmem:[#allocation28_spill] sm:$0xff] }
 0x202   : > { %v555_v10 = vmul.f32 0.02, %v1360_v17 }
 0x203   : > { %v564_v15 = vadd.f32 %v548_v19, %v532_v14 }
 0x205   : > { %580 = vxpose.xlu1.b32.cont [8/16] (narrow) %v564_v15, 8 }
 0x208   : > { %v517_v18 = vld [vmem:[#allocation4 + $0x40] sm:$0xff] }
 0x209   : > { %v533_v11 = vmul.f32 -2.0, %v517_v18  ;;  %v1361_v18 = vld [vmem:[#allocation29_spill] sm:$0xff] }
 0x20b   : > { %v565_v61 = vadd.f32 %v549_v20, %v533_v11  ;;  %v556_v20 = vmul.f32 0.02, %v1361_v18 }
 0x20d   : > { %581 = vxpose.xlu1.b32.cont [9/16] (narrow) %v565_v61, 8 }
 0x212   : > { %v426_v49 = vpop.f32.mrf.mxu3 }
 0x213   : > { %v456_v55 = vadd.f32 %v426_v49, %v375_v25  ;;  %v502_v25 = vld [vmem:[#allocation3] sm:$0xff]  ;;  %v1363_v49 = vld [vmem:[#allocation22_spill] sm:$0xff] }
 0x215   : > { %472 = vst.msk [vmem:[#allocation4 + $0x48] sm:$0xff] %vm122_vm0, %v456_v55  ;;  %v500_v55 = vmul.f32 0.02, %v1363_v49 }
 0x21a   : > { %v429_v63 = vpop.f32.mrf.mxu3 }
 0x21b   : > { %v457_v5 = vadd.f32 %v429_v63, %v376_v57 }
 0x21c   : > { %v518_v12 = vld [vmem:[#allocation4 + $0x48] sm:$0xff] }
 0x21d   : > { %473 = vst.msk [vmem:[#allocation4 + $0x50] sm:$0xff] %vm122_vm0, %v457_v5  ;;  %v534_v51 = vmul.f32 -2.0, %v518_v12  ;;  %v503_v5 = vmul.f32 0.8, %v502_v25 }
 0x21f   : > { %v566_v13 = vadd.f32 %v550_v60, %v534_v51 }
 0x221   : > { %582 = vxpose.xlu1.b32.cont [10/16] (narrow) %v566_v13, 8 }
 0x222   : > { %v432_v47 = vpop.f32.mrf.mxu3 }
 0x223   : > { %v458_v42 = vadd.f32 %v432_v47, %v377_v50 }
 0x224   : > { %v519_v6 = vld [vmem:[#allocation4 + $0x50] sm:$0xff] }
 0x225   : > { %474 = vst.msk [vmem:[#allocation4 + $0x58] sm:$0xff] %vm122_vm0, %v458_v42  ;;  %v535_v36 = vmul.f32 -2.0, %v519_v6 }
 0x227   : > { %v567_v35 = vadd.f32 %v551_v41, %v535_v36 }
 0x229   : > { %583 = vxpose.xlu1.b32.cont [11/16] (narrow) %v567_v35, 8 }
 0x22a   : > { %v435_v32 = vpop.f32.mrf.mxu3 }
 0x22b   : > { %v459_v27 = vadd.f32 %v435_v32, %v378_v30  ;;  %s735_s9 = spop %734 }
 0x22c   : > { %v520_v29 = vld [vmem:[#allocation4 + $0x58] sm:$0xff]  ;;  %s120_s10 = smul.f32 0.01, %s735_s9 }
 0x22d   : > { %475 = vst.msk [vmem:[#allocation4 + $0x60] sm:$0xff] %vm122_vm0, %v459_v27  ;;  %v536_v26 = vmul.f32 -2.0, %v520_v29 }
 0x22e   : > { %s1309_s0 = sadd.f32 %s916_s0, %s120_s10  }
 0x22f   : > { %v568_v2 = vadd.f32 %v552_v24, %v536_v26 }
 0x230   : > { %s1362_s11 = smov %s1309_s0 }
 0x231   : > { %584 = vxpose.xlu1.b32.cont [12/16] (narrow) %v568_v2, 8  ;;  %s1364_s0 = smov %s1362_s11 }
 0x232   : > { %v438_v28 = vpop.f32.mrf.mxu3 }
 0x233   : > { %v460_v21 = vadd.f32 %v438_v28, %v379_v22 }
 0x234   : > { %v521_v23 = vld [vmem:[#allocation4 + $0x60] sm:$0xff] }
 0x235   : > { %476 = vst.msk [vmem:[#allocation4 + $0x68] sm:$0xff] %vm122_vm0, %v460_v21  ;;  %v537_v56 = vmul.f32 -2.0, %v521_v23 }
 0x237   : > { %v569_v8 = vadd.f32 %v553_v40, %v537_v56 }
 0x239   : > { %585 = vxpose.xlu1.b32.cont [13/16] (narrow) %v569_v8, 8 }
 0x23a   : > { %v441_v46 = vpop.f32.mrf.mxu3 }
 0x23b   : > { %v461_v52 = vadd.f32 %v441_v46, %v380_v43 }
 0x23c   : > { %v522_v54 = vld [vmem:[#allocation4 + $0x68] sm:$0xff] }
 0x23d   : > { %477 = vst.msk [vmem:[#allocation4 + $0x70] sm:$0xff] %vm122_vm0, %v461_v52  ;;  %v538_v9 = vmul.f32 -2.0, %v522_v54 }
 0x23f   : > { %v570_v4 = vadd.f32 %v554_v58, %v538_v9 }
 0x241   : > { %586 = vxpose.xlu1.b32.cont [14/16] (narrow) %v570_v4, 8 }
 0x242   : > { %v444_v62 = vpop.f32.mrf.mxu3 }
 0x243   : > { %v462_v0 = vadd.f32 %v444_v62, %v381_v59 }
 0x244   : > { %v523_v16 = vld [vmem:[#allocation4 + $0x70] sm:$0xff] }
 0x245   : > { %478 = vst.msk [vmem:[#allocation4 + $0x78] sm:$0xff] %vm122_vm0, %v462_v0  ;;  %v539_v19 = vmul.f32 -2.0, %v523_v16  ;;  %vm613_vm0 = vcmask (%p72_p0), 1040384  }
 0x246   :  { %v614_v42 = vsel (%p72_p0), %vm613_vm0, %v612_v1, 0.0 }
 0x247   : > { %v571_v14 = vadd.f32 %v555_v10, %v539_v19  ;;  %615 = vadd.xlane.f32.xlu0 (%p72_p0), %v614_v42 }
 0x249   : > { %587 = vxpose.xlu1.b32.cont [15/16] (narrow) %v571_v14, 8 }
 0x24c   : > { %v524_v15 = vld [vmem:[#allocation4 + $0x78] sm:$0xff] }
 0x24d   : > { %v540_v11 = vmul.f32 -2.0, %v524_v15 }
 0x24f   : > { %v572_v61 = vadd.f32 %v556_v20, %v540_v11 }
 0x251   : > { %588 = vxpose.xlu1.b32.end [16/16] (narrow) %v572_v61, 8 }
 0x261   : > { %v496_v57 = vpop.f32.mrf.mxu2 }
 0x262   : > { %v499_v63 = vmul.f32 -2.0, %v496_v57 }
 0x264   : > { %v501_v12 = vadd.f32 %v500_v55, %v499_v63 }
 0x266   : > { %v504_v37 = vadd.f32 %v503_v5, %v501_v12 }
 0x268   : > { %505 = vst [vmem:[#allocation3] sm:$0xff] %v504_v37  ;;  %v506_v60 = vmul.f32 0.001, %v504_v37 }
 0x26a   : > { %v507_v51 = vsub.f32 %v1363_v49, %v506_v60 }
 0x26c   : > { %508 = vst [vmem:[#allocation14] sm:$0xff] %v507_v51 }
 0x26d   :  { %648 = dma.vmem_to_hbm [thread:$0]  (%p72_p0), %s644_s18, 128, %s646_s21, [#allocation15]  }
 0x27d   : > { %v589_v13 = vpop.trf.xlu1 }
 0x27e   : > { %v607_v50 = vadd.f32 %v606_v48, %v589_v13 }
 0x280   : > { %608 = vst [vmem:[#allocation2] sm:$0xff] %v607_v50  ;;  %v609_v45 = vmul.f32 0.001, %v607_v50  ;;  %74 = sbr.rel (!%p72_p0) target bundleno = 22 (0x16), region = 68 }
 0x282   : > { %v610_v47 = vsub.f32 %v981_v3, %v609_v45 }
 0x284   : > { %611 = vst [vmem:[#allocation13] sm:$0xff] %v610_v47 }
 0x285   :  { %637 = dma.vmem_to_hbm [thread:$0]  %s633_s13, 128, %s635_s16, [#allocation8]  }
 0x2ba   :  { %v616_v3 = vpop.xlane.xlu0 %615 }
 0x2bb   :  { %v617_v6 = vrot.slane %v616_v3, 4 }
 0x2bd   :  { %v618_v44 = vadd.f32 %v617_v6, %v616_v3 }
 0x2bf   :  { %v619_v39 = vrot.slane %v618_v44, 2 }
 0x2c1   :  { %v620_v41 = vadd.f32 %v619_v39, %v618_v44 }
 0x2c3   :  { %v621_v36 = vrot.slane %v620_v41, 1 }
 0x2c5   :  { %v622_v33 = vadd.f32 %v621_v36, %v620_v41 }
 0x2c7   :  { %736 = vpush %v622_v33 }
 0x2f8   :  { %s737_s24 = spop %736 }
 0x2f9   :  { %s624_s25 = sadd.f32 %s737_s24, %s1362_s11 }
 0x2fb   :  { %626 = sst [smem:[#allocation16]] %s624_s25 }
 0x2fc   :  { %657 = dma.smem_to_hbm %s931_s4, 16, %s655_s23, [#allocation9]  }
 0x2fd   :  { %908 = dma.done.wait [#allocation8], 128  }
 0x2fe   :  { %909 = vsyncadd [#allocation8], 4294967168 }
 0x2ff   :  { %910 = dma.done.wait [#allocation15], 128  }
 0x300   :  { %911 = vsyncadd [#allocation15], 4294967168 }
 0x301   :  { %912 = dma.done.wait [#allocation9], 16  }
 0x302   :  { %913 = vsyncadd [#allocation9], 4294967280 }
 0x303   :  { %670 = sfence }
 0x304   :  { %671 = vsyncpa [#allocation7], 1 }
 0x305   :  { %672 = vsyncpa [#allocation11], 1 }
 0x306   :  { %673 = vsyncpa [#allocation8], 1 }
 0x307   :  { %674 = vsyncpa [#allocation15], 1 }
 0x308   :  { %675 = vsyncpa [#allocation9], 1 }

</bundles_post_ra>
